<compile_context>
chip_gen: v7x
topology: tpu7x:2x2x1
jax: 0.10.0
libtpu: 0.0.40
codegen_flags: <defaults>
</compile_context>

<pallas_src>
import math

import jax
import jax.numpy as jnp
from jax.experimental import pallas as pl
from jax.experimental.pallas import tpu as pltpu

# ---- small config (mirrors __C.HIDDEN_SIZE / __C.MULTI_HEAD) -----------------
B = 2          # batch
S = 8          # sequence length
H = 32         # HIDDEN_SIZE
NH = 4         # MULTI_HEAD
DH = H // NH   # head dim


def mha_kernel(q_ref, k_ref, v_ref, maskf_ref, wqkv_ref, bqkv_ref, wm_ref, bm_ref,
               out_ref, amap_ref):
    # q_ref/k_ref/v_ref: (B, S, H)       activations
    # maskf_ref:         (B, 1, S)       key-padding mask as f32 (1.0 = masked)
    # wqkv_ref:          (3, NH, H, DH)  prepacked per-head projection weights (x = q,k,v)
    # bqkv_ref:          (3, NH, 1, DH)  prepacked per-head projection biases
    # wm_ref:            (NH, DH, H)     prepacked per-head merge weight rows
    # bm_ref:            (1, H)          merge bias
    # out_ref:           (B, S, H)       merged context
    # amap_ref:          (B, NH, S, S)   attention maps (kernel-native layout)
    q2 = q_ref[...].reshape(B * S, H)          # leading-dim merge: layout no-op
    k2 = k_ref[...].reshape(B * S, H)
    v2 = v_ref[...].reshape(B * S, H)
    masked = maskf_ref[...] > 0.5              # (B, 1, S) bool, hoisted out of the loops
    scale = 1.0 / math.sqrt(DH)
    neg_inf = jnp.float32(-1e9)

    # --- per-head scores (head split lives in the prepacked weights, no lane slices) ---
    score_parts = []
    for h in range(NH):                        # static unroll, NH = 4
        qh = (jnp.dot(q2, wqkv_ref[0, h], preferred_element_type=jnp.float32)
              + bqkv_ref[0, h]).reshape(B, S, DH)
        kh = (jnp.dot(k2, wqkv_ref[1, h], preferred_element_type=jnp.float32)
              + bqkv_ref[1, h]).reshape(B, S, DH)
        s = jnp.einsum('bqd,bkd->bqk', qh, kh,
                       preferred_element_type=jnp.float32) * scale        # (B, S, S)
        s = jnp.where(masked, neg_inf, s)      # replacement semantics == masked_fill
        score_parts.append(s[:, None])         # (B, 1, S, S) — outer-axis expand, free

    scores = jnp.concatenate(score_parts, axis=1)                          # (B, NH, S, S)

    # --- one fused softmax over all heads ---
    smax = jnp.max(scores, axis=-1, keepdims=True)
    ex = jnp.exp(scores - smax)
    denom = jnp.sum(ex, axis=-1, keepdims=True)
    # exact reciprocal keeps the 1e-5 amap tolerance
    att = ex * pl.reciprocal(denom, approx=False)                          # (B, NH, S, S)
    amap_ref[...] = att                        # single full lane-dense store

    # --- context + merge projection accumulated per head (no atted scratch) ---
    acc = jnp.zeros((B * S, H), jnp.float32)
    for h in range(NH):
        vh = (jnp.dot(v2, wqkv_ref[2, h], preferred_element_type=jnp.float32)
              + bqkv_ref[2, h]).reshape(B, S, DH)
        ctx = jnp.einsum('bqk,bkd->bqd', att[:, h], vh,
                         preferred_element_type=jnp.float32)               # (B, S, DH)
        acc = acc + jnp.dot(ctx.reshape(B * S, DH), wm_ref[h],
                            preferred_element_type=jnp.float32)            # (B*S, H)

    out_ref[...] = (acc + bm_ref[...]).reshape(B, S, H)


def pack_params(params):
    """One-time parameter preprocessing (per review: hoisted out of the per-call path)."""
    wq, bq, wk, bk, wv, bv, wm, bm = params

    def heads_w(w):     # torch Linear weight (out,in) -> per-head columns of w.T: (NH, H, DH)
        return jnp.stack([w.T[:, h * DH:(h + 1) * DH] for h in range(NH)], axis=0)

    def heads_b(b):     # (H,) -> (NH, 1, DH)
        return b.reshape(NH, 1, DH)

    wqkv_heads = jnp.stack([heads_w(wq), heads_w(wk), heads_w(wv)], axis=0)   # (3, NH, H, DH)
    bqkv_heads = jnp.stack([heads_b(bq), heads_b(bk), heads_b(bv)], axis=0)   # (3, NH, 1, DH)
    wm_heads = wm.T.reshape(NH, DH, H)                                        # (NH, DH, H)
    bm2 = bm.reshape(1, H)                                                    # (1, H)
    return wqkv_heads, bqkv_heads, wm_heads, bm2


@jax.jit
def mhatt_forward(v, k, q, mask, packed):
    """v, k, q: (B, S, H) f32; mask: (B, 1, 1, S) bool (True = masked); packed = pack_params(...)."""
    wqkv_heads, bqkv_heads, wm_heads, bm2 = packed
    maskf = mask.reshape(B, 1, S).astype(jnp.float32)   # only per-call prep left in the wrapper

    vmem = pl.BlockSpec(memory_space=pltpu.MemorySpace.VMEM)
    out, amap = pl.pallas_call(
        mha_kernel,
        out_shape=(jax.ShapeDtypeStruct((B, S, H), jnp.float32),
                   jax.ShapeDtypeStruct((B, NH, S, S), jnp.float32)),
        in_specs=[vmem] * 8,
        out_specs=(vmem, vmem),
    )(q, k, v, maskf, wqkv_heads, bqkv_heads, wm_heads, bm2)
    return out, amap


def reference_forward(v, k, q, mask, params):
    """Pure-JAX replica of the PyTorch forward (eval mode) for validation."""
    wq, bq, wk, bk, wv, bv, wm, bm = params

    def lin(x, w, b):
        return x @ w.T + b

    def split(x):
        return x.reshape(B, S, NH, DH).transpose(0, 2, 1, 3)     # (B, NH, S, DH)

    qh, kh, vh = split(lin(q, wq, bq)), split(lin(k, wk, bk)), split(lin(v, wv, bv))
    scores = jnp.einsum('bhqd,bhkd->bhqk', qh, kh) / math.sqrt(DH)
    scores = jnp.where(mask, -1e9, scores)                       # mask (B,1,1,S) broadcasts
    amap = jax.nn.softmax(scores, axis=-1)
    ctx = jnp.einsum('bhqk,bhkd->bhqd', amap, vh)
    atted = ctx.transpose(0, 2, 1, 3).reshape(B, S, H)
    return lin(atted, wm, bm), amap


if __name__ == "__main__":
    key = jax.random.PRNGKey(0)
    ks = jax.random.split(key, 12)

    def init_w(kk):
        return jax.random.uniform(kk, (H, H), jnp.float32, -1.0, 1.0) / math.sqrt(H)

    def init_b(kk):
        return jax.random.uniform(kk, (H,), jnp.float32, -1.0, 1.0) / math.sqrt(H)

    params = (init_w(ks[0]), init_b(ks[1]),   # linear_q
              init_w(ks[2]), init_b(ks[3]),   # linear_k
              init_w(ks[4]), init_b(ks[5]),   # linear_v
              init_w(ks[6]), init_b(ks[7]))   # linear_merge

    q_in = jax.random.normal(ks[8], (B, S, H), jnp.float32)
    k_in = jax.random.normal(ks[9], (B, S, H), jnp.float32)
    v_in = jax.random.normal(ks[10], (B, S, H), jnp.float32)
    # VQA-style key-padding mask: last two key positions of batch 1 are masked.
    mask = jnp.zeros((B, 1, 1, S), dtype=bool).at[1, 0, 0, -2:].set(True)

    packed = jax.tree_util.tree_map(jax.block_until_ready, pack_params(params))  # one-time prep

    out, amap = mhatt_forward(v_in, k_in, q_in, mask, packed)
    out = jax.block_until_ready(out)
    amap = jax.block_until_ready(amap)

    ref_out, ref_amap = reference_forward(v_in, k_in, q_in, mask, params)
    assert jnp.allclose(out, ref_out, atol=1e-4, rtol=1e-4)
    assert jnp.allclose(amap, ref_amap, atol=1e-5, rtol=1e-4)
    print("KERNEL_OK")
</pallas_src>

<mosaic_0001>
module attributes {stable_mosaic.version = 11 : i64} {
  func.func @mha_kernel(%arg0: memref<2x8x32xf32, #tpu.memory_space<vmem>>, %arg1: memref<2x8x32xf32, #tpu.memory_space<vmem>>, %arg2: memref<2x8x32xf32, #tpu.memory_space<vmem>>, %arg3: memref<2x1x8xf32, #tpu.memory_space<vmem>>, %arg4: memref<3x4x32x8xf32, #tpu.memory_space<vmem>>, %arg5: memref<3x4x1x8xf32, #tpu.memory_space<vmem>>, %arg6: memref<4x8x32xf32, #tpu.memory_space<vmem>>, %arg7: memref<1x32xf32, #tpu.memory_space<vmem>>, %arg8: memref<2x8x32xf32, #tpu.memory_space<vmem>>, %arg9: memref<2x4x8x8xf32, #tpu.memory_space<vmem>>) attributes {dimension_semantics = [], scalar_prefetch = 0 : i64, scratch_operands = 0 : i64, tpu.core_type = #tpu.core_type<tc>} {
    %c0 = arith.constant 0 : index
    %c0_0 = arith.constant 0 : index
    %c0_1 = arith.constant 0 : index
    %0 = vector.load %arg0[%c0, %c0_0, %c0_1] : memref<2x8x32xf32, #tpu.memory_space<vmem>>, vector<2x8x32xf32>
    %1 = vector.shape_cast %0 : vector<2x8x32xf32> to vector<16x32xf32>
    %c0_2 = arith.constant 0 : index
    %c0_3 = arith.constant 0 : index
    %c0_4 = arith.constant 0 : index
    %2 = vector.load %arg1[%c0_2, %c0_3, %c0_4] : memref<2x8x32xf32, #tpu.memory_space<vmem>>, vector<2x8x32xf32>
    %3 = vector.shape_cast %2 : vector<2x8x32xf32> to vector<16x32xf32>
    %c0_5 = arith.constant 0 : index
    %c0_6 = arith.constant 0 : index
    %c0_7 = arith.constant 0 : index
    %4 = vector.load %arg2[%c0_5, %c0_6, %c0_7] : memref<2x8x32xf32, #tpu.memory_space<vmem>>, vector<2x8x32xf32>
    %5 = vector.shape_cast %4 : vector<2x8x32xf32> to vector<16x32xf32>
    %c0_8 = arith.constant 0 : index
    %c0_9 = arith.constant 0 : index
    %c0_10 = arith.constant 0 : index
    %6 = vector.load %arg3[%c0_8, %c0_9, %c0_10] : memref<2x1x8xf32, #tpu.memory_space<vmem>>, vector<2x1x8xf32>
    %cst = arith.constant 5.000000e-01 : f32
    %7 = vector.broadcast %cst : f32 to vector<2x1x8xf32>
    %8 = arith.cmpf ogt, %6, %7 : vector<2x1x8xf32>
    %c0_11 = arith.constant 0 : index
    %c0_12 = arith.constant 0 : index
    %c0_13 = arith.constant 0 : index
    %c0_14 = arith.constant 0 : index
    %9 = vector.load %arg4[%c0_11, %c0_12, %c0_13, %c0_14] : memref<3x4x32x8xf32, #tpu.memory_space<vmem>>, vector<1x1x32x8xf32>
    %10 = vector.shape_cast %9 : vector<1x1x32x8xf32> to vector<32x8xf32>
    %cst_15 = arith.constant dense<0.000000e+00> : vector<16x8xf32>
    %11 = tpu.matmul %1, %10, %cst_15 {dimension_numbers = #tpu.dot_dimension_numbers<[1], [0], [0], [1], [0, 0, 1, 1], [], []>} : vector<16x32xf32>, vector<32x8xf32>, vector<16x8xf32> -> vector<16x8xf32>
    %c0_16 = arith.constant 0 : index
    %c0_17 = arith.constant 0 : index
    %c0_18 = arith.constant 0 : index
    %c0_19 = arith.constant 0 : index
    %12 = vector.load %arg5[%c0_16, %c0_17, %c0_18, %c0_19] : memref<3x4x1x8xf32, #tpu.memory_space<vmem>>, vector<1x1x1x8xf32>
    %13 = vector.shape_cast %12 : vector<1x1x1x8xf32> to vector<1x8xf32>
    %14 = vector.broadcast %13 : vector<1x8xf32> to vector<16x8xf32>
    %15 = arith.addf %11, %14 : vector<16x8xf32>
    %16 = vector.shape_cast %15 : vector<16x8xf32> to vector<2x8x8xf32>
    %c1 = arith.constant 1 : index
    %c0_20 = arith.constant 0 : index
    %c0_21 = arith.constant 0 : index
    %c0_22 = arith.constant 0 : index
    %17 = vector.load %arg4[%c1, %c0_20, %c0_21, %c0_22] : memref<3x4x32x8xf32, #tpu.memory_space<vmem>>, vector<1x1x32x8xf32>
    %18 = vector.shape_cast %17 : vector<1x1x32x8xf32> to vector<32x8xf32>
    %cst_23 = arith.constant dense<0.000000e+00> : vector<16x8xf32>
    %19 = tpu.matmul %3, %18, %cst_23 {dimension_numbers = #tpu.dot_dimension_numbers<[1], [0], [0], [1], [0, 0, 1, 1], [], []>} : vector<16x32xf32>, vector<32x8xf32>, vector<16x8xf32> -> vector<16x8xf32>
    %c1_24 = arith.constant 1 : index
    %c0_25 = arith.constant 0 : index
    %c0_26 = arith.constant 0 : index
    %c0_27 = arith.constant 0 : index
    %20 = vector.load %arg5[%c1_24, %c0_25, %c0_26, %c0_27] : memref<3x4x1x8xf32, #tpu.memory_space<vmem>>, vector<1x1x1x8xf32>
    %21 = vector.shape_cast %20 : vector<1x1x1x8xf32> to vector<1x8xf32>
    %22 = vector.broadcast %21 : vector<1x8xf32> to vector<16x8xf32>
    %23 = arith.addf %19, %22 : vector<16x8xf32>
    %24 = vector.shape_cast %23 : vector<16x8xf32> to vector<2x8x8xf32>
    "tpu.trace_start"() <{level = 10 : i32, message = "bqd,bkd->bqk"}> : () -> ()
    %cst_28 = arith.constant dense<0.000000e+00> : vector<2x8x8xf32>
    %25 = tpu.matmul %16, %24, %cst_28 {dimension_numbers = #tpu.dot_dimension_numbers<[2], [2], [1], [1], [0, 0, 0, 1, 1, 1], [0], [0]>} : vector<2x8x8xf32>, vector<2x8x8xf32>, vector<2x8x8xf32> -> vector<2x8x8xf32>
    "tpu.trace_stop"() : () -> ()
    %cst_29 = arith.constant 0.353553385 : f32
    %26 = vector.broadcast %cst_29 : f32 to vector<2x8x8xf32>
    %27 = arith.mulf %25, %26 : vector<2x8x8xf32>
    %cst_30 = arith.constant -1.000000e+09 : f32
    %28 = vector.shape_cast %8 : vector<2x1x8xi1> to vector<2x1x8xi1>
    %29 = vector.broadcast %28 : vector<2x1x8xi1> to vector<2x8x8xi1>
    %30 = vector.broadcast %cst_30 : f32 to vector<2x8x8xf32>
    %31 = arith.select %29, %30, %27 : vector<2x8x8xi1>, vector<2x8x8xf32>
    %32 = vector.shape_cast %31 : vector<2x8x8xf32> to vector<2x1x8x8xf32>
    %c0_31 = arith.constant 0 : index
    %c1_32 = arith.constant 1 : index
    %c0_33 = arith.constant 0 : index
    %c0_34 = arith.constant 0 : index
    %33 = vector.load %arg4[%c0_31, %c1_32, %c0_33, %c0_34] : memref<3x4x32x8xf32, #tpu.memory_space<vmem>>, vector<1x1x32x8xf32>
    %34 = vector.shape_cast %33 : vector<1x1x32x8xf32> to vector<32x8xf32>
    %cst_35 = arith.constant dense<0.000000e+00> : vector<16x8xf32>
    %35 = tpu.matmul %1, %34, %cst_35 {dimension_numbers = #tpu.dot_dimension_numbers<[1], [0], [0], [1], [0, 0, 1, 1], [], []>} : vector<16x32xf32>, vector<32x8xf32>, vector<16x8xf32> -> vector<16x8xf32>
    %c0_36 = arith.constant 0 : index
    %c1_37 = arith.constant 1 : index
    %c0_38 = arith.constant 0 : index
    %c0_39 = arith.constant 0 : index
    %36 = vector.load %arg5[%c0_36, %c1_37, %c0_38, %c0_39] : memref<3x4x1x8xf32, #tpu.memory_space<vmem>>, vector<1x1x1x8xf32>
    %37 = vector.shape_cast %36 : vector<1x1x1x8xf32> to vector<1x8xf32>
    %38 = vector.broadcast %37 : vector<1x8xf32> to vector<16x8xf32>
    %39 = arith.addf %35, %38 : vector<16x8xf32>
    %40 = vector.shape_cast %39 : vector<16x8xf32> to vector<2x8x8xf32>
    %c1_40 = arith.constant 1 : index
    %c1_41 = arith.constant 1 : index
    %c0_42 = arith.constant 0 : index
    %c0_43 = arith.constant 0 : index
    %41 = vector.load %arg4[%c1_40, %c1_41, %c0_42, %c0_43] : memref<3x4x32x8xf32, #tpu.memory_space<vmem>>, vector<1x1x32x8xf32>
    %42 = vector.shape_cast %41 : vector<1x1x32x8xf32> to vector<32x8xf32>
    %cst_44 = arith.constant dense<0.000000e+00> : vector<16x8xf32>
    %43 = tpu.matmul %3, %42, %cst_44 {dimension_numbers = #tpu.dot_dimension_numbers<[1], [0], [0], [1], [0, 0, 1, 1], [], []>} : vector<16x32xf32>, vector<32x8xf32>, vector<16x8xf32> -> vector<16x8xf32>
    %c1_45 = arith.constant 1 : index
    %c1_46 = arith.constant 1 : index
    %c0_47 = arith.constant 0 : index
    %c0_48 = arith.constant 0 : index
    %44 = vector.load %arg5[%c1_45, %c1_46, %c0_47, %c0_48] : memref<3x4x1x8xf32, #tpu.memory_space<vmem>>, vector<1x1x1x8xf32>
    %45 = vector.shape_cast %44 : vector<1x1x1x8xf32> to vector<1x8xf32>
    %46 = vector.broadcast %45 : vector<1x8xf32> to vector<16x8xf32>
    %47 = arith.addf %43, %46 : vector<16x8xf32>
    %48 = vector.shape_cast %47 : vector<16x8xf32> to vector<2x8x8xf32>
    "tpu.trace_start"() <{level = 10 : i32, message = "bqd,bkd->bqk"}> : () -> ()
    %cst_49 = arith.constant dense<0.000000e+00> : vector<2x8x8xf32>
    %49 = tpu.matmul %40, %48, %cst_49 {dimension_numbers = #tpu.dot_dimension_numbers<[2], [2], [1], [1], [0, 0, 0, 1, 1, 1], [0], [0]>} : vector<2x8x8xf32>, vector<2x8x8xf32>, vector<2x8x8xf32> -> vector<2x8x8xf32>
    "tpu.trace_stop"() : () -> ()
    %cst_50 = arith.constant 0.353553385 : f32
    %50 = vector.broadcast %cst_50 : f32 to vector<2x8x8xf32>
    %51 = arith.mulf %49, %50 : vector<2x8x8xf32>
    %cst_51 = arith.constant -1.000000e+09 : f32
    %52 = vector.shape_cast %8 : vector<2x1x8xi1> to vector<2x1x8xi1>
    %53 = vector.broadcast %52 : vector<2x1x8xi1> to vector<2x8x8xi1>
    %54 = vector.broadcast %cst_51 : f32 to vector<2x8x8xf32>
    %55 = arith.select %53, %54, %51 : vector<2x8x8xi1>, vector<2x8x8xf32>
    %56 = vector.shape_cast %55 : vector<2x8x8xf32> to vector<2x1x8x8xf32>
    %c0_52 = arith.constant 0 : index
    %c2 = arith.constant 2 : index
    %c0_53 = arith.constant 0 : index
    %c0_54 = arith.constant 0 : index
    %57 = vector.load %arg4[%c0_52, %c2, %c0_53, %c0_54] : memref<3x4x32x8xf32, #tpu.memory_space<vmem>>, vector<1x1x32x8xf32>
    %58 = vector.shape_cast %57 : vector<1x1x32x8xf32> to vector<32x8xf32>
    %cst_55 = arith.constant dense<0.000000e+00> : vector<16x8xf32>
    %59 = tpu.matmul %1, %58, %cst_55 {dimension_numbers = #tpu.dot_dimension_numbers<[1], [0], [0], [1], [0, 0, 1, 1], [], []>} : vector<16x32xf32>, vector<32x8xf32>, vector<16x8xf32> -> vector<16x8xf32>
    %c0_56 = arith.constant 0 : index
    %c2_57 = arith.constant 2 : index
    %c0_58 = arith.constant 0 : index
    %c0_59 = arith.constant 0 : index
    %60 = vector.load %arg5[%c0_56, %c2_57, %c0_58, %c0_59] : memref<3x4x1x8xf32, #tpu.memory_space<vmem>>, vector<1x1x1x8xf32>
    %61 = vector.shape_cast %60 : vector<1x1x1x8xf32> to vector<1x8xf32>
    %62 = vector.broadcast %61 : vector<1x8xf32> to vector<16x8xf32>
    %63 = arith.addf %59, %62 : vector<16x8xf32>
    %64 = vector.shape_cast %63 : vector<16x8xf32> to vector<2x8x8xf32>
    %c1_60 = arith.constant 1 : index
    %c2_61 = arith.constant 2 : index
    %c0_62 = arith.constant 0 : index
    %c0_63 = arith.constant 0 : index
    %65 = vector.load %arg4[%c1_60, %c2_61, %c0_62, %c0_63] : memref<3x4x32x8xf32, #tpu.memory_space<vmem>>, vector<1x1x32x8xf32>
    %66 = vector.shape_cast %65 : vector<1x1x32x8xf32> to vector<32x8xf32>
    %cst_64 = arith.constant dense<0.000000e+00> : vector<16x8xf32>
    %67 = tpu.matmul %3, %66, %cst_64 {dimension_numbers = #tpu.dot_dimension_numbers<[1], [0], [0], [1], [0, 0, 1, 1], [], []>} : vector<16x32xf32>, vector<32x8xf32>, vector<16x8xf32> -> vector<16x8xf32>
    %c1_65 = arith.constant 1 : index
    %c2_66 = arith.constant 2 : index
    %c0_67 = arith.constant 0 : index
    %c0_68 = arith.constant 0 : index
    %68 = vector.load %arg5[%c1_65, %c2_66, %c0_67, %c0_68] : memref<3x4x1x8xf32, #tpu.memory_space<vmem>>, vector<1x1x1x8xf32>
    %69 = vector.shape_cast %68 : vector<1x1x1x8xf32> to vector<1x8xf32>
    %70 = vector.broadcast %69 : vector<1x8xf32> to vector<16x8xf32>
    %71 = arith.addf %67, %70 : vector<16x8xf32>
    %72 = vector.shape_cast %71 : vector<16x8xf32> to vector<2x8x8xf32>
    "tpu.trace_start"() <{level = 10 : i32, message = "bqd,bkd->bqk"}> : () -> ()
    %cst_69 = arith.constant dense<0.000000e+00> : vector<2x8x8xf32>
    %73 = tpu.matmul %64, %72, %cst_69 {dimension_numbers = #tpu.dot_dimension_numbers<[2], [2], [1], [1], [0, 0, 0, 1, 1, 1], [0], [0]>} : vector<2x8x8xf32>, vector<2x8x8xf32>, vector<2x8x8xf32> -> vector<2x8x8xf32>
    "tpu.trace_stop"() : () -> ()
    %cst_70 = arith.constant 0.353553385 : f32
    %74 = vector.broadcast %cst_70 : f32 to vector<2x8x8xf32>
    %75 = arith.mulf %73, %74 : vector<2x8x8xf32>
    %cst_71 = arith.constant -1.000000e+09 : f32
    %76 = vector.shape_cast %8 : vector<2x1x8xi1> to vector<2x1x8xi1>
    %77 = vector.broadcast %76 : vector<2x1x8xi1> to vector<2x8x8xi1>
    %78 = vector.broadcast %cst_71 : f32 to vector<2x8x8xf32>
    %79 = arith.select %77, %78, %75 : vector<2x8x8xi1>, vector<2x8x8xf32>
    %80 = vector.shape_cast %79 : vector<2x8x8xf32> to vector<2x1x8x8xf32>
    %c0_72 = arith.constant 0 : index
    %c3 = arith.constant 3 : index
    %c0_73 = arith.constant 0 : index
    %c0_74 = arith.constant 0 : index
    %81 = vector.load %arg4[%c0_72, %c3, %c0_73, %c0_74] : memref<3x4x32x8xf32, #tpu.memory_space<vmem>>, vector<1x1x32x8xf32>
    %82 = vector.shape_cast %81 : vector<1x1x32x8xf32> to vector<32x8xf32>
    %cst_75 = arith.constant dense<0.000000e+00> : vector<16x8xf32>
    %83 = tpu.matmul %1, %82, %cst_75 {dimension_numbers = #tpu.dot_dimension_numbers<[1], [0], [0], [1], [0, 0, 1, 1], [], []>} : vector<16x32xf32>, vector<32x8xf32>, vector<16x8xf32> -> vector<16x8xf32>
    %c0_76 = arith.constant 0 : index
    %c3_77 = arith.constant 3 : index
    %c0_78 = arith.constant 0 : index
    %c0_79 = arith.constant 0 : index
    %84 = vector.load %arg5[%c0_76, %c3_77, %c0_78, %c0_79] : memref<3x4x1x8xf32, #tpu.memory_space<vmem>>, vector<1x1x1x8xf32>
    %85 = vector.shape_cast %84 : vector<1x1x1x8xf32> to vector<1x8xf32>
    %86 = vector.broadcast %85 : vector<1x8xf32> to vector<16x8xf32>
    %87 = arith.addf %83, %86 : vector<16x8xf32>
    %88 = vector.shape_cast %87 : vector<16x8xf32> to vector<2x8x8xf32>
    %c1_80 = arith.constant 1 : index
    %c3_81 = arith.constant 3 : index
    %c0_82 = arith.constant 0 : index
    %c0_83 = arith.constant 0 : index
    %89 = vector.load %arg4[%c1_80, %c3_81, %c0_82, %c0_83] : memref<3x4x32x8xf32, #tpu.memory_space<vmem>>, vector<1x1x32x8xf32>
    %90 = vector.shape_cast %89 : vector<1x1x32x8xf32> to vector<32x8xf32>
    %cst_84 = arith.constant dense<0.000000e+00> : vector<16x8xf32>
    %91 = tpu.matmul %3, %90, %cst_84 {dimension_numbers = #tpu.dot_dimension_numbers<[1], [0], [0], [1], [0, 0, 1, 1], [], []>} : vector<16x32xf32>, vector<32x8xf32>, vector<16x8xf32> -> vector<16x8xf32>
    %c1_85 = arith.constant 1 : index
    %c3_86 = arith.constant 3 : index
    %c0_87 = arith.constant 0 : index
    %c0_88 = arith.constant 0 : index
    %92 = vector.load %arg5[%c1_85, %c3_86, %c0_87, %c0_88] : memref<3x4x1x8xf32, #tpu.memory_space<vmem>>, vector<1x1x1x8xf32>
    %93 = vector.shape_cast %92 : vector<1x1x1x8xf32> to vector<1x8xf32>
    %94 = vector.broadcast %93 : vector<1x8xf32> to vector<16x8xf32>
    %95 = arith.addf %91, %94 : vector<16x8xf32>
    %96 = vector.shape_cast %95 : vector<16x8xf32> to vector<2x8x8xf32>
    "tpu.trace_start"() <{level = 10 : i32, message = "bqd,bkd->bqk"}> : () -> ()
    %cst_89 = arith.constant dense<0.000000e+00> : vector<2x8x8xf32>
    %97 = tpu.matmul %88, %96, %cst_89 {dimension_numbers = #tpu.dot_dimension_numbers<[2], [2], [1], [1], [0, 0, 0, 1, 1, 1], [0], [0]>} : vector<2x8x8xf32>, vector<2x8x8xf32>, vector<2x8x8xf32> -> vector<2x8x8xf32>
    "tpu.trace_stop"() : () -> ()
    %cst_90 = arith.constant 0.353553385 : f32
    %98 = vector.broadcast %cst_90 : f32 to vector<2x8x8xf32>
    %99 = arith.mulf %97, %98 : vector<2x8x8xf32>
    %cst_91 = arith.constant -1.000000e+09 : f32
    %100 = vector.shape_cast %8 : vector<2x1x8xi1> to vector<2x1x8xi1>
    %101 = vector.broadcast %100 : vector<2x1x8xi1> to vector<2x8x8xi1>
    %102 = vector.broadcast %cst_91 : f32 to vector<2x8x8xf32>
    %103 = arith.select %101, %102, %99 : vector<2x8x8xi1>, vector<2x8x8xf32>
    %104 = vector.shape_cast %103 : vector<2x8x8xf32> to vector<2x1x8x8xf32>
    %105 = tpu.concatenate %32, %56, %80, %104 in 1 : vector<2x1x8x8xf32>, vector<2x1x8x8xf32>, vector<2x1x8x8xf32>, vector<2x1x8x8xf32> -> vector<2x4x8x8xf32>
    %cst_92 = arith.constant dense<0xFF800000> : vector<2x4x8xf32>
    %106 = vector.multi_reduction <maximumf>, %105, %cst_92 [3] : vector<2x4x8x8xf32> to vector<2x4x8xf32>
    %107 = vector.shape_cast %106 : vector<2x4x8xf32> to vector<2x4x8x1xf32>
    %108 = vector.broadcast %107 : vector<2x4x8x1xf32> to vector<2x4x8x8xf32>
    %109 = arith.subf %105, %108 : vector<2x4x8x8xf32>
    %110 = math.exp %109 : vector<2x4x8x8xf32>
    %cst_93 = arith.constant dense<0.000000e+00> : vector<2x4x8xf32>
    %111 = vector.multi_reduction <add>, %110, %cst_93 [3] : vector<2x4x8x8xf32> to vector<2x4x8xf32>
    %112 = vector.shape_cast %111 : vector<2x4x8xf32> to vector<2x4x8x1xf32>
    %113 = tpu.reciprocal %112 : vector<2x4x8x1xf32> -> vector<2x4x8x1xf32>
    %114 = vector.broadcast %113 : vector<2x4x8x1xf32> to vector<2x4x8x8xf32>
    %115 = arith.mulf %110, %114 : vector<2x4x8x8xf32>
    %c0_94 = arith.constant 0 : index
    %c0_95 = arith.constant 0 : index
    %c0_96 = arith.constant 0 : index
    %c0_97 = arith.constant 0 : index
    %116 = vector.load %arg9[%c0_94, %c0_95, %c0_96, %c0_97] : memref<2x4x8x8xf32, #tpu.memory_space<vmem>>, vector<2x4x8x8xf32>
    tpu.vector_store %arg9[%c0_94, %c0_95, %c0_96, %c0_97], %115 {strides = array<i32>} : memref<2x4x8x8xf32, #tpu.memory_space<vmem>>, vector<2x4x8x8xf32>,
    %cst_98 = arith.constant 0.000000e+00 : f32
    %117 = vector.broadcast %cst_98 : f32 to vector<16x32xf32>
    %c2_99 = arith.constant 2 : index
    %c0_100 = arith.constant 0 : index
    %c0_101 = arith.constant 0 : index
    %c0_102 = arith.constant 0 : index
    %118 = vector.load %arg4[%c2_99, %c0_100, %c0_101, %c0_102] : memref<3x4x32x8xf32, #tpu.memory_space<vmem>>, vector<1x1x32x8xf32>
    %119 = vector.shape_cast %118 : vector<1x1x32x8xf32> to vector<32x8xf32>
    %cst_103 = arith.constant dense<0.000000e+00> : vector<16x8xf32>
    %120 = tpu.matmul %5, %119, %cst_103 {dimension_numbers = #tpu.dot_dimension_numbers<[1], [0], [0], [1], [0, 0, 1, 1], [], []>} : vector<16x32xf32>, vector<32x8xf32>, vector<16x8xf32> -> vector<16x8xf32>
    %c2_104 = arith.constant 2 : index
    %c0_105 = arith.constant 0 : index
    %c0_106 = arith.constant 0 : index
    %c0_107 = arith.constant 0 : index
    %121 = vector.load %arg5[%c2_104, %c0_105, %c0_106, %c0_107] : memref<3x4x1x8xf32, #tpu.memory_space<vmem>>, vector<1x1x1x8xf32>
    %122 = vector.shape_cast %121 : vector<1x1x1x8xf32> to vector<1x8xf32>
    %123 = vector.broadcast %122 : vector<1x8xf32> to vector<16x8xf32>
    %124 = arith.addf %120, %123 : vector<16x8xf32>
    %125 = vector.shape_cast %124 : vector<16x8xf32> to vector<2x8x8xf32>
    %126 = vector.extract_strided_slice %115 {offsets = [0, 0, 0, 0], sizes = [2, 1, 8, 8], strides = [1, 1, 1, 1]} : vector<2x4x8x8xf32> to vector<2x1x8x8xf32>
    %127 = vector.shape_cast %126 : vector<2x1x8x8xf32> to vector<2x8x8xf32>
    "tpu.trace_start"() <{level = 10 : i32, message = "bqk,bkd->bqd"}> : () -> ()
    %cst_108 = arith.constant dense<0.000000e+00> : vector<2x8x8xf32>
    %128 = tpu.matmul %127, %125, %cst_108 {dimension_numbers = #tpu.dot_dimension_numbers<[2], [1], [1], [2], [0, 0, 0, 1, 1, 2], [0], [0]>} : vector<2x8x8xf32>, vector<2x8x8xf32>, vector<2x8x8xf32> -> vector<2x8x8xf32>
    "tpu.trace_stop"() : () -> ()
    %129 = vector.shape_cast %128 : vector<2x8x8xf32> to vector<16x8xf32>
    %c0_109 = arith.constant 0 : index
    %c0_110 = arith.constant 0 : index
    %c0_111 = arith.constant 0 : index
    %130 = vector.load %arg6[%c0_109, %c0_110, %c0_111] : memref<4x8x32xf32, #tpu.memory_space<vmem>>, vector<1x8x32xf32>
    %131 = vector.shape_cast %130 : vector<1x8x32xf32> to vector<8x32xf32>
    %cst_112 = arith.constant dense<0.000000e+00> : vector<16x32xf32>
    %132 = tpu.matmul %129, %131, %cst_112 {dimension_numbers = #tpu.dot_dimension_numbers<[1], [0], [0], [1], [0, 0, 1, 1], [], []>} : vector<16x8xf32>, vector<8x32xf32>, vector<16x32xf32> -> vector<16x32xf32>
    %133 = arith.addf %117, %132 : vector<16x32xf32>
    %c2_113 = arith.constant 2 : index
    %c1_114 = arith.constant 1 : index
    %c0_115 = arith.constant 0 : index
    %c0_116 = arith.constant 0 : index
    %134 = vector.load %arg4[%c2_113, %c1_114, %c0_115, %c0_116] : memref<3x4x32x8xf32, #tpu.memory_space<vmem>>, vector<1x1x32x8xf32>
    %135 = vector.shape_cast %134 : vector<1x1x32x8xf32> to vector<32x8xf32>
    %cst_117 = arith.constant dense<0.000000e+00> : vector<16x8xf32>
    %136 = tpu.matmul %5, %135, %cst_117 {dimension_numbers = #tpu.dot_dimension_numbers<[1], [0], [0], [1], [0, 0, 1, 1], [], []>} : vector<16x32xf32>, vector<32x8xf32>, vector<16x8xf32> -> vector<16x8xf32>
    %c2_118 = arith.constant 2 : index
    %c1_119 = arith.constant 1 : index
    %c0_120 = arith.constant 0 : index
    %c0_121 = arith.constant 0 : index
    %137 = vector.load %arg5[%c2_118, %c1_119, %c0_120, %c0_121] : memref<3x4x1x8xf32, #tpu.memory_space<vmem>>, vector<1x1x1x8xf32>
    %138 = vector.shape_cast %137 : vector<1x1x1x8xf32> to vector<1x8xf32>
    %139 = vector.broadcast %138 : vector<1x8xf32> to vector<16x8xf32>
    %140 = arith.addf %136, %139 : vector<16x8xf32>
    %141 = vector.shape_cast %140 : vector<16x8xf32> to vector<2x8x8xf32>
    %142 = vector.extract_strided_slice %115 {offsets = [0, 1, 0, 0], sizes = [2, 1, 8, 8], strides = [1, 1, 1, 1]} : vector<2x4x8x8xf32> to vector<2x1x8x8xf32>
    %143 = vector.shape_cast %142 : vector<2x1x8x8xf32> to vector<2x8x8xf32>
    "tpu.trace_start"() <{level = 10 : i32, message = "bqk,bkd->bqd"}> : () -> ()
    %cst_122 = arith.constant dense<0.000000e+00> : vector<2x8x8xf32>
    %144 = tpu.matmul %143, %141, %cst_122 {dimension_numbers = #tpu.dot_dimension_numbers<[2], [1], [1], [2], [0, 0, 0, 1, 1, 2], [0], [0]>} : vector<2x8x8xf32>, vector<2x8x8xf32>, vector<2x8x8xf32> -> vector<2x8x8xf32>
    "tpu.trace_stop"() : () -> ()
    %145 = vector.shape_cast %144 : vector<2x8x8xf32> to vector<16x8xf32>
    %c1_123 = arith.constant 1 : index
    %c0_124 = arith.constant 0 : index
    %c0_125 = arith.constant 0 : index
    %146 = vector.load %arg6[%c1_123, %c0_124, %c0_125] : memref<4x8x32xf32, #tpu.memory_space<vmem>>, vector<1x8x32xf32>
    %147 = vector.shape_cast %146 : vector<1x8x32xf32> to vector<8x32xf32>
    %cst_126 = arith.constant dense<0.000000e+00> : vector<16x32xf32>
    %148 = tpu.matmul %145, %147, %cst_126 {dimension_numbers = #tpu.dot_dimension_numbers<[1], [0], [0], [1], [0, 0, 1, 1], [], []>} : vector<16x8xf32>, vector<8x32xf32>, vector<16x32xf32> -> vector<16x32xf32>
    %149 = arith.addf %133, %148 : vector<16x32xf32>
    %c2_127 = arith.constant 2 : index
    %c2_128 = arith.constant 2 : index
    %c0_129 = arith.constant 0 : index
    %c0_130 = arith.constant 0 : index
    %150 = vector.load %arg4[%c2_127, %c2_128, %c0_129, %c0_130] : memref<3x4x32x8xf32, #tpu.memory_space<vmem>>, vector<1x1x32x8xf32>
    %151 = vector.shape_cast %150 : vector<1x1x32x8xf32> to vector<32x8xf32>
    %cst_131 = arith.constant dense<0.000000e+00> : vector<16x8xf32>
    %152 = tpu.matmul %5, %151, %cst_131 {dimension_numbers = #tpu.dot_dimension_numbers<[1], [0], [0], [1], [0, 0, 1, 1], [], []>} : vector<16x32xf32>, vector<32x8xf32>, vector<16x8xf32> -> vector<16x8xf32>
    %c2_132 = arith.constant 2 : index
    %c2_133 = arith.constant 2 : index
    %c0_134 = arith.constant 0 : index
    %c0_135 = arith.constant 0 : index
    %153 = vector.load %arg5[%c2_132, %c2_133, %c0_134, %c0_135] : memref<3x4x1x8xf32, #tpu.memory_space<vmem>>, vector<1x1x1x8xf32>
    %154 = vector.shape_cast %153 : vector<1x1x1x8xf32> to vector<1x8xf32>
    %155 = vector.broadcast %154 : vector<1x8xf32> to vector<16x8xf32>
    %156 = arith.addf %152, %155 : vector<16x8xf32>
    %157 = vector.shape_cast %156 : vector<16x8xf32> to vector<2x8x8xf32>
    %158 = vector.extract_strided_slice %115 {offsets = [0, 2, 0, 0], sizes = [2, 1, 8, 8], strides = [1, 1, 1, 1]} : vector<2x4x8x8xf32> to vector<2x1x8x8xf32>
    %159 = vector.shape_cast %158 : vector<2x1x8x8xf32> to vector<2x8x8xf32>
    "tpu.trace_start"() <{level = 10 : i32, message = "bqk,bkd->bqd"}> : () -> ()
    %cst_136 = arith.constant dense<0.000000e+00> : vector<2x8x8xf32>
    %160 = tpu.matmul %159, %157, %cst_136 {dimension_numbers = #tpu.dot_dimension_numbers<[2], [1], [1], [2], [0, 0, 0, 1, 1, 2], [0], [0]>} : vector<2x8x8xf32>, vector<2x8x8xf32>, vector<2x8x8xf32> -> vector<2x8x8xf32>
    "tpu.trace_stop"() : () -> ()
    %161 = vector.shape_cast %160 : vector<2x8x8xf32> to vector<16x8xf32>
    %c2_137 = arith.constant 2 : index
    %c0_138 = arith.constant 0 : index
    %c0_139 = arith.constant 0 : index
    %162 = vector.load %arg6[%c2_137, %c0_138, %c0_139] : memref<4x8x32xf32, #tpu.memory_space<vmem>>, vector<1x8x32xf32>
    %163 = vector.shape_cast %162 : vector<1x8x32xf32> to vector<8x32xf32>
    %cst_140 = arith.constant dense<0.000000e+00> : vector<16x32xf32>
    %164 = tpu.matmul %161, %163, %cst_140 {dimension_numbers = #tpu.dot_dimension_numbers<[1], [0], [0], [1], [0, 0, 1, 1], [], []>} : vector<16x8xf32>, vector<8x32xf32>, vector<16x32xf32> -> vector<16x32xf32>
    %165 = arith.addf %149, %164 : vector<16x32xf32>
    %c2_141 = arith.constant 2 : index
    %c3_142 = arith.constant 3 : index
    %c0_143 = arith.constant 0 : index
    %c0_144 = arith.constant 0 : index
    %166 = vector.load %arg4[%c2_141, %c3_142, %c0_143, %c0_144] : memref<3x4x32x8xf32, #tpu.memory_space<vmem>>, vector<1x1x32x8xf32>
    %167 = vector.shape_cast %166 : vector<1x1x32x8xf32> to vector<32x8xf32>
    %cst_145 = arith.constant dense<0.000000e+00> : vector<16x8xf32>
    %168 = tpu.matmul %5, %167, %cst_145 {dimension_numbers = #tpu.dot_dimension_numbers<[1], [0], [0], [1], [0, 0, 1, 1], [], []>} : vector<16x32xf32>, vector<32x8xf32>, vector<16x8xf32> -> vector<16x8xf32>
    %c2_146 = arith.constant 2 : index
    %c3_147 = arith.constant 3 : index
    %c0_148 = arith.constant 0 : index
    %c0_149 = arith.constant 0 : index
    %169 = vector.load %arg5[%c2_146, %c3_147, %c0_148, %c0_149] : memref<3x4x1x8xf32, #tpu.memory_space<vmem>>, vector<1x1x1x8xf32>
    %170 = vector.shape_cast %169 : vector<1x1x1x8xf32> to vector<1x8xf32>
    %171 = vector.broadcast %170 : vector<1x8xf32> to vector<16x8xf32>
    %172 = arith.addf %168, %171 : vector<16x8xf32>
    %173 = vector.shape_cast %172 : vector<16x8xf32> to vector<2x8x8xf32>
    %174 = vector.extract_strided_slice %115 {offsets = [0, 3, 0, 0], sizes = [2, 1, 8, 8], strides = [1, 1, 1, 1]} : vector<2x4x8x8xf32> to vector<2x1x8x8xf32>
    %175 = vector.shape_cast %174 : vector<2x1x8x8xf32> to vector<2x8x8xf32>
    "tpu.trace_start"() <{level = 10 : i32, message = "bqk,bkd->bqd"}> : () -> ()
    %cst_150 = arith.constant dense<0.000000e+00> : vector<2x8x8xf32>
    %176 = tpu.matmul %175, %173, %cst_150 {dimension_numbers = #tpu.dot_dimension_numbers<[2], [1], [1], [2], [0, 0, 0, 1, 1, 2], [0], [0]>} : vector<2x8x8xf32>, vector<2x8x8xf32>, vector<2x8x8xf32> -> vector<2x8x8xf32>
    "tpu.trace_stop"() : () -> ()
    %177 = vector.shape_cast %176 : vector<2x8x8xf32> to vector<16x8xf32>
    %c3_151 = arith.constant 3 : index
    %c0_152 = arith.constant 0 : index
    %c0_153 = arith.constant 0 : index
    %178 = vector.load %arg6[%c3_151, %c0_152, %c0_153] : memref<4x8x32xf32, #tpu.memory_space<vmem>>, vector<1x8x32xf32>
    %179 = vector.shape_cast %178 : vector<1x8x32xf32> to vector<8x32xf32>
    %cst_154 = arith.constant dense<0.000000e+00> : vector<16x32xf32>
    %180 = tpu.matmul %177, %179, %cst_154 {dimension_numbers = #tpu.dot_dimension_numbers<[1], [0], [0], [1], [0, 0, 1, 1], [], []>} : vector<16x8xf32>, vector<8x32xf32>, vector<16x32xf32> -> vector<16x32xf32>
    %181 = arith.addf %165, %180 : vector<16x32xf32>
    %c0_155 = arith.constant 0 : index
    %c0_156 = arith.constant 0 : index
    %182 = vector.load %arg7[%c0_155, %c0_156] : memref<1x32xf32, #tpu.memory_space<vmem>>, vector<1x32xf32>
    %183 = vector.broadcast %182 : vector<1x32xf32> to vector<16x32xf32>
    %184 = arith.addf %181, %183 : vector<16x32xf32>
    %185 = vector.shape_cast %184 : vector<16x32xf32> to vector<2x8x32xf32>
    %c0_157 = arith.constant 0 : index
    %c0_158 = arith.constant 0 : index
    %c0_159 = arith.constant 0 : index
    %186 = vector.load %arg8[%c0_157, %c0_158, %c0_159] : memref<2x8x32xf32, #tpu.memory_space<vmem>>, vector<2x8x32xf32>
    tpu.vector_store %arg8[%c0_157, %c0_158, %c0_159], %185 {strides = array<i32>} : memref<2x8x32xf32, #tpu.memory_space<vmem>>, vector<2x8x32xf32>,
    return
  }
}

</mosaic_0001>

<bundles_post_ra>
// kernel: mhatt_forward.1
= control target key start
LH: loop header
LB: loop body
LE: loop exit
PB: predicated region body
PF: predicated region fallthrough
CT: control target
= control target key end

     0   :  { %15 = vsyncpa [#allocation3], 0  ;;  %vm54_vm0 = vcmask 261120   ;;  %s3987_s0 = inlined_call_operand.vmem [shape: f32[2,8,32], index: 0, kind: input, shape index: {}]   ;;  %s3988_s1 = inlined_call_operand.vmem [shape: f32[2,8,32], index: 1, kind: input, shape index: {}]   ;;  %s3989_s2 = inlined_call_operand.vmem [shape: f32[2,8,32], index: 2, kind: input, shape index: {}]   ;;  %s3990_s3 = inlined_call_operand.vmem [shape: f32[2,1,8], index: 3, kind: input, shape index: {}]   ;;  %s3991_s4 = inlined_call_operand.vmem [shape: f32[3,4,32,8], index: 4, kind: input, shape index: {}]   ;;  %s3992_s5 = inlined_call_operand.vmem [shape: f32[3,4,1,8], index: 5, kind: input, shape index: {}]   ;;  %s3993_s6 = inlined_call_operand.vmem [shape: f32[4,8,32], index: 6, kind: input, shape index: {}]   ;;  %s3994_s7 = inlined_call_operand.vmem [shape: f32[1,32], index: 7, kind: input, shape index: {}]   ;;  %s3995_s8 = inlined_call_operand.hbm [shape: f32[2,8,32], index: 8, kind: output, shape index: {0}]   ;;  %s3996_s9 = inlined_call_operand.hbm [shape: f32[2,4,8,8], index: 9, kind: output, shape index: {1}]  }
   0x1   :  { %v2814_v0 = vld [vmem:[%s3991_s4 + $0x80] sm:$0xff]  ;;  %v2815_v1 = vld [vmem:[%s3991_s4 + $0x88] sm:$0xff]  ;;  %v2816_v5 = vld [vmem:[%s3991_s4 + $0x90] sm:$0xff] }
   0x2   :  { %v43_v2 = vld [vmem:[%s3991_s4] sm:$0xff]  ;;  %v3294_v3 = vpack.c.bf16 %v2815_v1, %v2814_v0  ;;  %v44_v4 = vld [vmem:[%s3991_s4 + $0x8] sm:$0xff]  ;;  %v2817_v6 = vld [vmem:[%s3991_s4 + $0x98] sm:$0xff] }
   0x3   :  { %v3286_v7 = vpack.c.bf16 %v44_v4, %v43_v2  ;;  %v3298_v8 = vpack.c.bf16 %v2817_v6, %v2816_v5  ;;  %v45_v9 = vld [vmem:[%s3991_s4 + $0x10] sm:$0xff]  ;;  %v46_v10 = vld [vmem:[%s3991_s4 + $0x18] sm:$0xff]  ;;  %v3559_v11 = vld [vmem:[%s3988_s1] sm:$0xff] }
   0x4   :  { %3295 = vmatprep.subr.bf16.mxu1 %v3294_v3  ;;  %v3290_v12 = vpack.c.bf16 %v46_v10, %v45_v9  ;;  %3073 = vmatprep.mubr.msk.f32.mxu1 %vm54_vm0, %v3559_v11  ;;  %v3566_v13 = vld [vmem:[%s3987_s0] sm:$0xff] }
   0x5   :  { %3297 = vmatpush3.bf16.msra.mxu1 %v3294_v3  ;;  %3287 = vmatprep.subr.bf16.mxu0 %v3286_v7 }
   0x6   :  { %16 = vsyncpa [#allocation5], 0  ;;  %3289 = vmatpush3.bf16.msra.mxu0 %v3286_v7  ;;  %3299 = vmatprep.subr.bf16.mxu1 %v3298_v8  ;;  %v3573_v14 = vld [vmem:[%s3988_s1 + $0x8] sm:$0xff]  ;;  %v3475_v16 = vmov 0.0   ;;  %vm3476_vm1 = vmmov 0   ;;  %v2826_v17 = vld [vmem:[%s3991_s4 + $0x20] sm:$0xff]  ;;  %v387_v41 = vlaneseq }
   0x7   :  { %3291 = vmatprep.subr.bf16.mxu0 %v3290_v12  ;;  %3062 = vmatprep.mubr.msk.f32.mxu0 %vm54_vm0, %v3566_v13  ;;  %v3578_v15 = vld [vmem:[%s3987_s0 + $0x8] sm:$0xff]  ;;  %v2828_v20 = vld [vmem:[%s3991_s4 + $0x30] sm:$0xff]  ;;  %v2829_v21 = vld [vmem:[%s3991_s4 + $0x38] sm:$0xff]  ;;  %vm230_vm2 = vcmask 64512   ;;  %v3477_v46 = vmov 0  }
   0x8   :  { %v2827_v18 = vld [vmem:[%s3991_s4 + $0x28] sm:$0xff]  ;;  %v3306_v22 = vpack.c.bf16 %v2829_v21, %v2828_v20  ;;  %v2819_v23 = vld [vmem:[%s3992_s5 + $0x4] ss:$0 sm:$0xff]  ;;  %v2811_v25 = vld [vmem:[%s3992_s5] ss:$0 sm:$0xff]  ;;  %v388_v43 = vshrl.u32 %v387_v41, 7 }
   0x9   :  { %3301 = vmatpush3.bf16.msra.mxu1 %v3298_v8  ;;  %v3302_v19 = vpack.c.bf16 %v2827_v18, %v2826_v17  ;;  %v2834_v30 = vld [vmem:[%s3991_s4 + $0xa0] sm:$0xff]  ;;  %v2835_v31 = vld [vmem:[%s3991_s4 + $0xa8] sm:$0xff]  ;;  %v2836_v35 = vld [vmem:[%s3991_s4 + $0xb0] sm:$0xff] }
   0xa   :  { %3293 = vmatpush3.bf16.msra.mxu0 %v3290_v12  ;;  %3076 = vmatprep.subr.mxu1 %v3475_v16  ;;  %v3310_v33 = vpack.c.bf16 %v2835_v31, %v2834_v30  ;;  %v2837_v36 = vld [vmem:[%s3991_s4 + $0xb8] sm:$0xff]  ;;  %v39_v42 = vld [vmem:[%s3990_s3] sm:$0x1]  ;;  %v40_v44 = vld [vmem:[%s3990_s3 + $0x1] sm:$0x1]  ;;  %v389_v45 = vsub.s32 0, %v388_v43 }
   0xb   :  { %3303 = vmatprep.subr.bf16.mxu0 %v3302_v19  ;;  %v3314_v38 = vpack.c.bf16 %v2837_v36, %v2836_v35  ;;  %vm41_vm3 = vcmp.gt.f32.partialorder %v39_v42, 0.5  ;;  %vm42_vm4 = vcmp.gt.f32.partialorder %v40_v44, 0.5  ;;  %v2854_v61 = vld [vmem:[%s3991_s4 + $0xc0] sm:$0xff]  ;;  %v2855_v62 = vld [vmem:[%s3991_s4 + $0xc8] sm:$0xff]  ;;  %v2856_v8 = vld [vmem:[%s3991_s4 + $0xd0] sm:$0xff] }
   0xc   :  { %3074 = vmatmul.mubr.msk.f32.vlgmr.msra.gmra.mrb[0].mxu1 %vm54_vm0, %v3573_v14  ;;  %v385_v47 = vsel %vm41_vm3, 1, %v3477_v46  ;;  %v386_v49 = vsel %vm42_vm4, 1, %v3477_v46  ;;  %v2839_v63 = vld [vmem:[%s3992_s5 + $0x5] ss:$0 sm:$0xff]  ;;  %v2847_v1 = vld [vmem:[%s3991_s4 + $0x48] sm:$0xff]  ;;  %v3326_v4 = vpack.c.bf16 %v2855_v62, %v2854_v61  ;;  %v2857_v9 = vld [vmem:[%s3991_s4 + $0xd8] sm:$0xff] }
   0xd   :  { %3063 = vmatmul.mubr.msk.f32.vlgmr.msra.gmra.mrb[0].mxu0 %vm54_vm0, %v3578_v15  ;;  %3078 = vmatprep.mubr.msk.f32.mxu1 %vm3476_vm1, %v3475_v16  ;;  %v3644_v48 = vrot.slane %v385_v47, %v389_v45  ;;  %v3647_v51 = vrot.slane %v386_v49, %v389_v45  ;;  %v2846_v0 = vld [vmem:[%s3991_s4 + $0x40] sm:$0xff]  ;;  %v2848_v17 = vld [vmem:[%s3991_s4 + $0x50] sm:$0xff]  ;;  %v2849_v18 = vld [vmem:[%s3991_s4 + $0x58] sm:$0xff]  ;;  %v3330_v20 = vpack.c.bf16 %v2857_v9, %v2856_v8 }
   0xe   :  { %3094 = vmatprep.mubr.msk.f32.mxu0 %vm54_vm0, %v3566_v13  ;;  %3305 = vmatpush3.bf16.msra.mxu0 %v3302_v19  ;;  %v2831_v2 = vld [vmem:[%s3992_s5 + $0x1] ss:$0 sm:$0xff]  ;;  %v3318_v7 = vpack.c.bf16 %v2847_v1, %v2846_v0  ;;  %v3322_v21 = vpack.c.bf16 %v2849_v18, %v2848_v17  ;;  %v2867_v43 = vld [vmem:[%s3991_s4 + $0x68] sm:$0xff]  ;;  %v2851_v44 = vld [vmem:[%s3992_s5 + $0x2] ss:$0 sm:$0xff] }
   0xf   :  { %3307 = vmatprep.subr.bf16.mxu0 %v3306_v22  ;;  %vm395_vm5 = vcmp.eq.s32.totalorder %v3644_v48, 1  ;;  %vm396_vm6 = vcmp.eq.s32.totalorder %v3647_v51, 1  ;;  %v2866_v42 = vld [vmem:[%s3991_s4 + $0x60] sm:$0xff]  ;;  %v2869_v61 = vld [vmem:[%s3991_s4 + $0x78] sm:$0xff]  ;;  %v2901_v48 = vld [vmem:[%s3992_s5 + $0x9] ss:$0 sm:$0xff] }
  0x12   :  { %3309 = vmatpush3.bf16.msra.mxu0 %v3306_v22 }
  0x13   :  { %3108 = vmatprep.subr.mxu0 %v3475_v16 }
  0x15   :  { %3095 = vmatmul.mubr.msk.f32.vlgmr.msra.gmra.mrb[2].mxu0 %vm54_vm0, %v3578_v15 }
  0x16   :  { %3110 = vmatprep.mubr.msk.f32.mxu0 %vm3476_vm1, %v3475_v16 }
  0xdf   :  { %v3075_v24 = vpop.f32.mrb[0].mxu1 }
  0xe0   :  { %v221_v26 = vpop.f32.mrb[1].mxu1  ;;  %v3064_v27 = vpop.f32.mrb[0].mxu0  ;;  %v227_v34 = vadd.f32 %v3075_v24, %v2819_v23 }
  0xe1   :  { %v222_v28 = vadd.f32 %v2819_v23, %v221_v26  ;;  %v127_v29 = vpop.f32.mrb[1].mxu0  ;;  %v133_v37 = vadd.f32 %v3064_v27, %v2811_v25 }
  0xe2   :  { %v128_v32 = vadd.f32 %v2811_v25, %v127_v29 }
  0xe3   :  { %3077 = vmatpush3.xpose.msk.msra.mxu1 %vm230_vm2, %v222_v28 }
  0xe4   :  { %3081 = vmatprep.subr.mxu1 %v3475_v16 }
  0xe6   :  { %3079 = vmatmul.mubr.msk.f32.vlgmr.msra.gmra.mrb[2].mxu1 %vm230_vm2, %v128_v32 }
  0xe7   :  { %3082 = vmatpush3.xpose.msk.msra.mxu1 %vm230_vm2, %v227_v34  ;;  %3083 = vmatprep.mubr.msk.f32.mxu1 %vm3476_vm1, %v3475_v16 }
  0xe8   :  { %3311 = vmatprep.subr.bf16.mxu1 %v3310_v33  ;;  %v3096_v39 = vpop.f32.mrb[2].mxu0 }
  0xe9   :  { %v478_v40 = vpop.f32.mrb[3].mxu0  ;;  %v484_v12 = vadd.f32 %v3096_v39, %v2831_v2  ;;  %v2875_v39 = vld [vmem:[%s3991_s4 + $0xe8] sm:$0xff] }
  0xea   :  { %3084 = vmatmul.mubr.msk.f32.vlgmr.msra.gmra.mrb[4].mxu1 %vm230_vm2, %v133_v37  ;;  %v479_v19 = vadd.f32 %v2831_v2, %v478_v40  ;;  %v2859_v40 = vld [vmem:[%s3992_s5 + $0x6] ss:$0 sm:$0xff] }
  0xeb   :  { %3313 = vmatpush3.bf16.msra.mxu1 %v3310_v33  ;;  %3105 = vmatprep.mubr.msk.f32.mxu1 %vm54_vm0, %v3559_v11 }
  0xec   :  { %3315 = vmatprep.subr.bf16.mxu1 %v3314_v38 }
  0xef   :  { %3317 = vmatpush3.bf16.msra.mxu1 %v3314_v38  ;;  %v2874_v38 = vld [vmem:[%s3991_s4 + $0xe0] sm:$0xff] }
  0xf0   :  { %3113 = vmatprep.subr.mxu1 %v3475_v16  ;;  %v3342_v46 = vpack.c.bf16 %v2875_v39, %v2874_v38 }
  0xf2   :  { %3106 = vmatmul.mubr.msk.f32.vlgmr.msra.gmra.mrb[6].mxu1 %vm54_vm0, %v3573_v14 }
  0xf3   :  { %3115 = vmatprep.mubr.msk.f32.mxu1 %vm3476_vm1, %v3475_v16 }
 0x1b9   :  { %v303_v50 = vpop.f32.mrb[2].mxu1 }
 0x1ba   :  { %v383_v52 = vmul.f32 0.35355338, %v303_v50  ;;  %v3080_v53 = vpop.f32.mrb[3].mxu1 }
 0x1bb   :  { %v3334_v53 = vpack.c.bf16 %v2867_v43, %v2866_v42  ;;  %v2889_v42 = vld [vmem:[%s3991_s4 + $0x118] sm:$0xff] }
 0x1bc   :  { %v397_v54 = vsel %vm395_vm5, -1e+09, %v383_v52 }
 0x1bd   :  { %v379_v55 = vpop.f32.mrb[4].mxu1  ;;  %v1395_v56 = vsel %vm230_vm2, %v397_v54, -inf }
 0x1be   :  { %v384_v57 = vmul.f32 0.35355338, %v379_v55  ;;  %1396 = vmax.xlane.f32.xlu0 %v1395_v56  ;;  %v3085_v58 = vpop.f32.mrb[5].mxu1  ;;  %v2877_v55 = vld [vmem:[%s3991_s4 + $0xf8] sm:$0xff] }
 0x1c0   :  { %v398_v59 = vsel %vm396_vm6, -1e+09, %v384_v57 }
 0x1c1   :  { %v1407_v60 = vsel %vm230_vm2, %v398_v59, -inf }
 0x1c2   :  { %1408 = vmax.xlane.f32.xlu0 %v1407_v60  ;;  %v2868_v60 = vld [vmem:[%s3991_s4 + $0x70] sm:$0xff] }
 0x1c3   :  { %v3338_v1 = vpack.c.bf16 %v2869_v61, %v2868_v60 }
 0x1c5   :  { %v3107_v3 = vpop.f32.mrb[6].mxu1 }
 0x1c6   :  { %v572_v5 = vadd.f32 %v3107_v3, %v2839_v63  ;;  %v566_v6 = vpop.f32.mrb[7].mxu1 }
 0x1c7   :  { %v567_v10 = vadd.f32 %v2839_v63, %v566_v6 }
 0x1c8   :  { %3114 = vmatpush3.xpose.msk.msra.mxu1 %vm230_vm2, %v572_v5 }
 0x1c9   :  { %3109 = vmatpush3.xpose.msk.msra.mxu0 %vm230_vm2, %v567_v10  ;;  %3327 = vmatprep.subr.bf16.mxu1 %v3326_v4 }
 0x1ca   :  { %3319 = vmatprep.subr.bf16.mxu0 %v3318_v7 }
 0x1cb   :  { %3116 = vmatmul.mubr.msk.f32.vlgmr.msra.gmra.mrb[8].mxu1 %vm230_vm2, %v484_v12 }
 0x1cc   :  { %3111 = vmatmul.mubr.msk.f32.vlgmr.msra.gmra.mrb[4].mxu0 %vm230_vm2, %v479_v19  ;;  %3329 = vmatpush3.bf16.msra.mxu1 %v3326_v4 }
 0x1cd   :  { %3321 = vmatpush3.bf16.msra.mxu0 %v3318_v7  ;;  %3331 = vmatprep.subr.bf16.mxu1 %v3330_v20 }
 0x1ce   :  { %3323 = vmatprep.subr.bf16.mxu0 %v3322_v21  ;;  %3137 = vmatprep.mubr.msk.f32.mxu1 %vm54_vm0, %v3559_v11 }
 0x1cf   :  { %3126 = vmatprep.mubr.msk.f32.mxu0 %vm54_vm0, %v3566_v13 }
 0x1d0   :  { %3333 = vmatpush3.bf16.msra.mxu1 %v3330_v20 }
 0x1d1   :  { %3325 = vmatpush3.bf16.msra.mxu0 %v3322_v21  ;;  %3145 = vmatprep.subr.mxu1 %v3475_v16 }
 0x1d2   :  { %3140 = vmatprep.subr.mxu0 %v3475_v16 }
 0x1d3   :  { %3138 = vmatmul.mubr.msk.f32.vlgmr.msra.gmra.mrb[10].mxu1 %vm54_vm0, %v3573_v14 }
 0x1d4   :  { %3127 = vmatmul.mubr.msk.f32.vlgmr.msra.gmra.mrb[6].mxu0 %vm54_vm0, %v3578_v15  ;;  %3147 = vmatprep.mubr.msk.f32.mxu1 %vm3476_vm1, %v3475_v16 }
 0x1d5   :  { %3142 = vmatprep.mubr.msk.f32.mxu0 %vm3476_vm1, %v3475_v16 }
 0x24b   :  { %v1397_v22 = vpop.xlane.xlu0 %1396 }
 0x24c   :  { %v1419_v23 = vsub.f32 %v397_v54, %v1397_v22  ;;  %v2876_v54 = vld [vmem:[%s3991_s4 + $0xf0] sm:$0xff] }
 0x24d   :  { %v3346_v63 = vpack.c.bf16 %v2877_v55, %v2876_v54 }
 0x24e   :  { %v1427_v24 = vmul.f32 1.442695, %v1419_v23 }
 0x24f   :  { %v1409_v27 = vpop.xlane.xlu0 %1408 }
 0x250   :  { %3395 = vpow2.f32 %v1427_v24  ;;  %v1423_v28 = vsub.f32 %v398_v59, %v1409_v27 }
 0x252   :  { %v1435_v29 = vmul.f32 1.442695, %v1423_v28 }
 0x254   :  { %3397 = vpow2.f32 %v1435_v29  ;;  %v2879_v29 = vld [vmem:[%s3992_s5 + $0x7] ss:$0 sm:$0xff] }
 0x25a   :  { %v3704_v25 = vpop.eup %3395 }
 0x25b   :  { %v1443_v26 = vsel %vm230_vm2, %v3704_v25, 0.0 }
 0x25c   :  { %1444 = vadd.xlane.f32.xlu0 %v1443_v26 }
 0x25e   :  { %v3398_v56 = vpop.eup %3397 }
 0x25f   :  { %v1455_v0 = vsel %vm230_vm2, %v3398_v56, 0.0 }
 0x29e   :  { %v723_v30 = vpop.f32.mrb[8].mxu1 }
 0x29f   :  { %v647_v31 = vpop.f32.mrb[4].mxu0  ;;  %v3117_v32 = vpop.f32.mrb[9].mxu1  ;;  %v728_v33 = vmul.f32 0.35355338, %v723_v30  ;;  %v2886_v30 = vld [vmem:[%s3991_s4 + $0x100] sm:$0xff] }
 0x2a0   :  { %v727_v34 = vmul.f32 0.35355338, %v647_v31  ;;  %v3112_v35 = vpop.f32.mrb[5].mxu0  ;;  %v2887_v31 = vld [vmem:[%s3991_s4 + $0x108] sm:$0xff]  ;;  %v2871_v32 = vld [vmem:[%s3992_s5 + $0x3] ss:$0 sm:$0xff] }
 0x2a1   :  { %v730_v41 = vsel %vm396_vm6, -1e+09, %v728_v33 }
 0x2a2   :  { %v729_v36 = vsel %vm395_vm5, -1e+09, %v727_v34  ;;  %v1410_v50 = vsel %vm230_vm2, %v730_v41, -inf }
 0x2a3   :  { %v1398_v37 = vsel %vm230_vm2, %v729_v36, -inf }
 0x2a4   :  { %1399 = vmax.xlane.f32.xlu1 %v1398_v37  ;;  %v3350_v37 = vpack.c.bf16 %v2887_v31, %v2886_v30  ;;  %v2913_v30 = vld [vmem:[%s3991_s4 + $0x150] sm:$0xff]  ;;  %v2914_v31 = vld [vmem:[%s3991_s4 + $0x158] sm:$0xff] }
 0x2a6   :  { %v3139_v45 = vpop.f32.mrb[10].mxu1 }
 0x2a7   :  { %v904_v47 = vadd.f32 %v3139_v45, %v2859_v40  ;;  %v898_v49 = vpop.f32.mrb[11].mxu1  ;;  %v3128_v52 = vpop.f32.mrb[6].mxu0  ;;  %v3810_v45 = vld [vmem:[%s3989_s2] sm:$0xff] }
 0x2a8   :  { %v899_v57 = vadd.f32 %v2859_v40, %v898_v49  ;;  %1411 = vmax.xlane.f32.xlu1 %v1410_v50  ;;  %v816_v58 = vadd.f32 %v3128_v52, %v2851_v44  ;;  %v810_v59 = vpop.f32.mrb[7].mxu0  ;;  %v2898_v50 = vld [vmem:[%s3991_s4 + $0x130] sm:$0xff]  ;;  %v2899_v52 = vld [vmem:[%s3991_s4 + $0x138] sm:$0xff] }
 0x2a9   :  { %3146 = vmatpush3.xpose.msk.msra.mxu1 %vm230_vm2, %v904_v47  ;;  %v811_v62 = vadd.f32 %v2851_v44, %v810_v59  ;;  %v2897_v47 = vld [vmem:[%s3991_s4 + $0x128] sm:$0xff]  ;;  %v3362_v54 = vpack.c.bf16 %v2899_v52, %v2898_v50 }
 0x2aa   :  { %3141 = vmatpush3.xpose.msk.msra.mxu0 %vm230_vm2, %v899_v57  ;;  %3343 = vmatprep.subr.bf16.mxu1 %v3342_v46 }
 0x2ab   :  { %3335 = vmatprep.subr.bf16.mxu0 %v3334_v53 }
 0x2ac   :  { %1456 = vadd.xlane.f32.xlu1 %v1455_v0  ;;  %3148 = vmatmul.mubr.msk.f32.vlgmr.msra.gmra.mrb[12].mxu1 %vm230_vm2, %v816_v58 }
 0x2ad   :  { %3143 = vmatmul.mubr.msk.f32.vlgmr.msra.gmra.mrb[8].mxu0 %vm230_vm2, %v811_v62  ;;  %3345 = vmatpush3.bf16.msra.mxu1 %v3342_v46  ;;  %v2896_v46 = vld [vmem:[%s3991_s4 + $0x120] sm:$0xff] }
 0x2ae   :  { %3337 = vmatpush3.bf16.msra.mxu0 %v3334_v53  ;;  %3347 = vmatprep.subr.bf16.mxu1 %v3346_v63  ;;  %v3358_v49 = vpack.c.bf16 %v2897_v47, %v2896_v46  ;;  %v3833_v53 = vld [vmem:[%s3989_s2 + $0x8] sm:$0xff] }
 0x2af   :  { %3339 = vmatprep.subr.bf16.mxu0 %v3338_v1  ;;  %3169 = vmatprep.mubr.msk.f32.mxu1 %vm54_vm0, %v3559_v11 }
 0x2b0   :  { %3158 = vmatprep.mubr.msk.f32.mxu0 %vm54_vm0, %v3566_v13 }
 0x2b1   :  { %3349 = vmatpush3.bf16.msra.mxu1 %v3346_v63 }
 0x2b2   :  { %3341 = vmatpush3.bf16.msra.mxu0 %v3338_v1  ;;  %3177 = vmatprep.subr.mxu1 %v3475_v16 }
 0x2b3   :  { %3172 = vmatprep.subr.mxu0 %v3475_v16 }
 0x2b4   :  { %3170 = vmatmul.mubr.msk.f32.vlgmr.msra.gmra.mrb[14].mxu1 %vm54_vm0, %v3573_v14 }
 0x2b5   :  { %3159 = vmatmul.mubr.msk.f32.vlgmr.msra.gmra.mrb[10].mxu0 %vm54_vm0, %v3578_v15  ;;  %3179 = vmatprep.mubr.msk.f32.mxu1 %vm3476_vm1, %v3475_v16 }
 0x2b6   :  { %3174 = vmatprep.mubr.msk.f32.mxu0 %vm3476_vm1, %v3475_v16 }
 0x2e9   :  { %v1445_v11 = vpop.xlane.xlu0 %1444 }
 0x2ea   :  { %3399 = vrcp.f32 %v1445_v11 }
 0x2f4   :  { %v3400_v13 = vpop.eup %3399 }
 0x2f5   :  { %v3764_v2 = vmul.f32 %v3400_v13, %v3704_v25 }
 0x2f7   :  { %1483 = vst.msk [vmem:[#allocation4] sm:$0xff] %vm230_vm2, %v3764_v2 }
 0x331   :  { %v1400_v3 = vpop.xlane.xlu1 %1399 }
 0x332   :  { %v1420_v14 = vsub.f32 %v729_v36, %v1400_v3 }
 0x334   :  { %v1429_v4 = vmul.f32 1.442695, %v1420_v14 }
 0x335   :  { %v1412_v5 = vpop.xlane.xlu1 %1411 }
 0x336   :  { %3401 = vpow2.f32 %v1429_v4  ;;  %v1424_v15 = vsub.f32 %v730_v41, %v1412_v5  ;;  %v2888_v41 = vld [vmem:[%s3991_s4 + $0x110] sm:$0xff] }
 0x337   :  { %v3354_v44 = vpack.c.bf16 %v2889_v42, %v2888_v41 }
 0x338   :  { %v1437_v6 = vmul.f32 1.442695, %v1424_v15 }
 0x339   :  { %v1457_v7 = vpop.xlane.xlu1 %1456 }
 0x33a   :  { %3403 = vpow2.f32 %v1437_v6 }
 0x33b   :  { %3405 = vrcp.f32 %v1457_v7 }
 0x340   :  { %v3768_v8 = vpop.eup %3401 }
 0x341   :  { %v1446_v9 = vsel %vm230_vm2, %v3768_v8, 0.0 }
 0x342   :  { %1447 = vadd.xlane.f32.xlu0 %v1446_v9 }
 0x344   :  { %v3772_v10 = vpop.eup %3403 }
 0x345   :  { %v3406_v12 = vpop.eup %3405  ;;  %v1458_v17 = vsel %vm230_vm2, %v3772_v10, 0.0 }
 0x346   :  { %v3776_v18 = vmul.f32 %v3406_v12, %v3398_v56  ;;  %1459 = vadd.xlane.f32.xlu1 %v1458_v17 }
 0x348   :  { %1487 = vst.msk [vmem:[#allocation4 + $0x20] sm:$0xff] %vm230_vm2, %v3776_v18 }
 0x37f   :  { %v1055_v19 = vpop.f32.mrb[12].mxu1 }
 0x380   :  { %v1060_v20 = vmul.f32 0.35355338, %v1055_v19  ;;  %v979_v21 = vpop.f32.mrb[8].mxu0  ;;  %v3149_v22 = vpop.f32.mrb[13].mxu1 }
 0x381   :  { %v1059_v23 = vmul.f32 0.35355338, %v979_v21  ;;  %v3144_v24 = vpop.f32.mrb[9].mxu0 }
 0x382   :  { %v1062_v25 = vsel %vm396_vm6, -1e+09, %v1060_v20  ;;  %v2891_v20 = vld [vmem:[%s3992_s5 + $0x8] ss:$0 sm:$0xff] }
 0x383   :  { %v1413_v26 = vsel %vm230_vm2, %v1062_v25, -inf  ;;  %v1061_v27 = vsel %vm395_vm5, -1e+09, %v1059_v23 }
 0x384   :  { %1414 = vmax.xlane.f32.xlu0 %v1413_v26  ;;  %v1401_v28 = vsel %vm230_vm2, %v1061_v27, -inf }
 0x385   :  { %1402 = vmax.xlane.f32.xlu1 %v1401_v28 }
 0x387   :  { %v3171_v33 = vpop.f32.mrb[14].mxu1 }
 0x388   :  { %v1236_v34 = vadd.f32 %v3171_v33, %v2879_v29  ;;  %v1230_v35 = vpop.f32.mrb[15].mxu1  ;;  %v3160_v36 = vpop.f32.mrb[10].mxu0 }
 0x389   :  { %v1231_v38 = vadd.f32 %v2879_v29, %v1230_v35  ;;  %v1148_v39 = vadd.f32 %v3160_v36, %v2871_v32  ;;  %v1142_v40 = vpop.f32.mrb[11].mxu0 }
 0x38a   :  { %3178 = vmatpush3.xpose.msk.msra.mxu1 %vm230_vm2, %v1236_v34  ;;  %v1143_v43 = vadd.f32 %v2871_v32, %v1142_v40 }
 0x38b   :  { %3173 = vmatpush3.xpose.msk.msra.mxu0 %vm230_vm2, %v1231_v38  ;;  %3193 = vmatprep.subr.mxu1 %v3475_v16  ;;  %v2906_v38 = vld [vmem:[%s3993_s6 + $0x8] sm:$0xff] }
 0x38c   :  { %3351 = vmatprep.subr.bf16.mxu0 %v3350_v37 }
 0x38d   :  { %3180 = vmatmul.mubr.msk.f32.vlgmr.msra.gmra.mrb[16].mxu1 %vm230_vm2, %v1148_v39  ;;  %v1731_v39 = vld [vmem:[%s3993_s6] sm:$0xff] }
 0x38e   :  { %3175 = vmatmul.mubr.msk.f32.vlgmr.msra.gmra.mrb[12].mxu0 %vm230_vm2, %v1143_v43  ;;  %3195 = vmatprep.mubr.msk.f32.mxu1 %vm3476_vm1, %v3475_v16 }
 0x38f   :  { %3353 = vmatpush3.bf16.msra.mxu0 %v3350_v37  ;;  %3190 = vmatprep.mubr.msk.f32.mxu0 %vm54_vm0, %v3810_v45 }
 0x390   :  { %3355 = vmatprep.subr.bf16.mxu0 %v3354_v44 }
 0x393   :  { %3357 = vmatpush3.bf16.msra.mxu0 %v3354_v44 }
 0x394   :  { %3359 = vmatprep.subr.bf16.mxu0 %v3358_v49 }
 0x396   :  { %3191 = vmatmul.mubr.msk.f32.vlgmr.msra.gmra.mrb[14].mxu0 %vm54_vm0, %v3833_v53 }
 0x397   :  { %3361 = vmatpush3.bf16.msra.mxu0 %v3358_v49  ;;  %3211 = vmatprep.mubr.msk.f32.mxu0 %vm54_vm0, %v3810_v45 }
 0x398   :  { %3363 = vmatprep.subr.bf16.mxu0 %v3362_v54 }
 0x39b   :  { %3365 = vmatpush3.bf16.msra.mxu0 %v3362_v54 }
 0x39c   :  { %3224 = vmatprep.subr.mxu0 %v2906_v38 }
 0x39e   :  { %3212 = vmatmul.mubr.msk.f32.vlgmr.msra.gmra.mrb[16].mxu0 %vm54_vm0, %v3833_v53 }
 0x39f   :  { %3225 = vmatpush3.msra.mxu0 %v2906_v38 }
 0x3a0   :  { %3229 = vmatprep.subr.mxu0 %v1731_v39 }
 0x3cf   :  { %v1448_v55 = vpop.xlane.xlu0 %1447 }
 0x3d0   :  { %3407 = vrcp.f32 %v1448_v55 }
 0x3d3   :  { %v1460_v56 = vpop.xlane.xlu1 %1459 }
 0x3d4   :  { %3409 = vrcp.f32 %v1460_v56 }
 0x3da   :  { %v3408_v57 = vpop.eup %3407 }
 0x3db   :  { %v1476_v58 = vmul.f32 %v3408_v57, %v3768_v8 }
 0x3dd   :  { %1484 = vst.msk [vmem:[#allocation4 + $0x8] sm:$0xff] %vm230_vm2, %v1476_v58 }
 0x3de   :  { %v3410_v59 = vpop.eup %3409 }
 0x3df   :  { %v1480_v60 = vmul.f32 %v3410_v59, %v3772_v10 }
 0x3e1   :  { %1488 = vst.msk [vmem:[#allocation4 + $0x28] sm:$0xff] %vm230_vm2, %v1480_v60 }
 0x411   :  { %v1415_v61 = vpop.xlane.xlu0 %1414 }
 0x412   :  { %v1425_v62 = vsub.f32 %v1062_v25, %v1415_v61  ;;  %v1403_v63 = vpop.xlane.xlu1 %1402  ;;  %v2911_v25 = vld [vmem:[%s3991_s4 + $0x140] sm:$0xff] }
 0x413   :  { %v1421_v0 = vsub.f32 %v1061_v27, %v1403_v63  ;;  %v2924_v63 = vld [vmem:[%s3991_s4 + $0x160] sm:$0xff] }
 0x414   :  { %v1439_v1 = vmul.f32 1.442695, %v1425_v62  ;;  %v2916_v62 = vld [vmem:[%s3992_s5 + $0xa] ss:$0 sm:$0xff] }
 0x415   :  { %v1431_v11 = vmul.f32 1.442695, %v1421_v0  ;;  %v2925_v0 = vld [vmem:[%s3991_s4 + $0x168] sm:$0xff] }
 0x416   :  { %3411 = vpow2.f32 %v1439_v1 }
 0x417   :  { %3413 = vpow2.f32 %v1431_v11  ;;  %v2926_v11 = vld [vmem:[%s3991_s4 + $0x170] sm:$0xff] }
 0x420   :  { %v3412_v13 = vpop.eup %3411 }
 0x421   :  { %v3414_v3 = vpop.eup %3413  ;;  %v1461_v14 = vsel %vm230_vm2, %v3412_v13, 0.0 }
 0x422   :  { %1462 = vadd.xlane.f32.xlu0 %v1461_v14  ;;  %v1449_v4 = vsel %vm230_vm2, %v3414_v3, 0.0 }
 0x423   :  { %1450 = vadd.xlane.f32.xlu1 %v1449_v4  ;;  %v3374_v4 = vpack.c.bf16 %v2925_v0, %v2924_v63 }
 0x460   :  { %v1387_v5 = vpop.f32.mrb[16].mxu1 }
 0x461   :  { %v1392_v15 = vmul.f32 0.35355338, %v1387_v5  ;;  %v1311_v6 = vpop.f32.mrb[12].mxu0  ;;  %v3181_v7 = vpop.f32.mrb[17].mxu1 }
 0x462   :  { %v1391_v8 = vmul.f32 0.35355338, %v1311_v6  ;;  %v3176_v9 = vpop.f32.mrb[13].mxu0 }
 0x463   :  { %v3849_v10 = vsel %vm396_vm6, -1e+09, %v1392_v15 }
 0x464   :  { %v1416_v12 = vsel %vm230_vm2, %v3849_v10, -inf  ;;  %v1393_v17 = vsel %vm395_vm5, -1e+09, %v1391_v8 }
 0x465   :  { %1417 = vmax.xlane.f32.xlu1 %v1416_v12  ;;  %v1404_v19 = vsel %vm230_vm2, %v1393_v17, -inf }
 0x466   :  { %1405 = vmax.xlane.f32.xlu0 %v1404_v19 }
 0x469   :  { %v3192_v21 = vpop.f32.mrb[14].mxu0 }
 0x46a   :  { %v1576_v22 = vpop.f32.mrb[15].mxu0  ;;  %v1582_v51 = vadd.f32 %v3192_v21, %v2891_v20  ;;  %v2929_v21 = vld [vmem:[%s3992_s5 + $0xb] ss:$0 sm:$0xff]  ;;  %s3478_s5 = smov [#allocation4]  }
 0x46b   :  { %v1577_v23 = vadd.f32 %v2891_v20, %v1576_v22  ;;  %s2796_s10 = sshll.u32 %s3478_s5, 4  ;;  %s2797_s10 = int_to_ptr.vmem [resolvable:$true] %s2796_s10 }
 0x46c   :  { %s3427_s11 = scalar_lea.vmem %s2797_s10, 1024  ;;  %p3432_p1 = scmp.lt.s32.totalorder %s2797_s10, %s2797_s10 }
 0x46d   :  { %3194 = vmatpush3.msra.mxu1 %v1577_v23  ;;  %p3428_p0 = scmp.ne.s32.totalorder %s2797_s10, %s3427_s11  ;;  %p3433_p2 = scmp.lt.s32.totalorder %s3427_s11, %s3427_s11 }
 0x46e   :  { %3196 = vmatmul.mubr.msk.f32.vlgmr.msra.gmra.mrb[18].mxu1 %vm230_vm2, %v3764_v2  ;;  %3198 = vmatprep.subr.mxu1 %v3475_v16  ;;  %v2912_v2 = vld [vmem:[%s3991_s4 + $0x148] sm:$0xff] }
 0x46f   :  { %3199 = vmatpush3.msra.mxu1 %v1582_v51  ;;  %3200 = vmatprep.mubr.msk.f32.mxu1 %vm3476_vm1, %v3475_v16  ;;  %v3366_v28 = vpack.c.bf16 %v2912_v2, %v2911_v25  ;;  %p3434_p3 = por %p3433_p2, %p3432_p1 }
 0x470   :  { %3214 = vmatprep.subr.mxu1 %v3475_v16 }
 0x471   :  { %v3213_v24 = vpop.f32.mrb[16].mxu0  ;;  %p3435_p4 = pnand %p3434_p3, %p3428_p0 }
 0x472   :  { %3201 = vmatmul.mubr.msk.f32.vlgmr.msra.gmra.mrb[20].mxu1 %vm230_vm2, %v3776_v18  ;;  %v1811_v26 = vpop.f32.mrb[17].mxu0  ;;  %v1817_v29 = vadd.f32 %v3213_v24, %v2901_v48  ;;  %v3370_v18 = vpack.c.bf16 %v2914_v31, %v2913_v30  ;;  %v2934_v24 = vld [vmem:[%s3993_s6 + $0x18] sm:$0xff] }
 0x473   :  { %v1812_v27 = vadd.f32 %v2901_v48, %v1811_v26  ;;  %3216 = vmatprep.mubr.msk.f32.mxu1 %vm3476_vm1, %v3475_v16 }
 0x475   :  { %3215 = vmatpush3.msra.mxu1 %v1812_v27 }
 0x476   :  { %3217 = vmatmul.mubr.msk.f32.vlgmr.msra.gmra.mrb[22].mxu1 %vm230_vm2, %v1476_v58  ;;  %3219 = vmatprep.subr.mxu1 %v3475_v16 }
 0x477   :  { %3220 = vmatpush3.msra.mxu1 %v1817_v29  ;;  %3221 = vmatprep.mubr.msk.f32.mxu1 %vm3476_vm1, %v3475_v16 }
 0x478   :  { %3367 = vmatprep.subr.bf16.mxu1 %v3366_v28 }
 0x47a   :  { %3222 = vmatmul.mubr.msk.f32.vlgmr.msra.gmra.mrb[24].mxu1 %vm230_vm2, %v1480_v60 }
 0x47b   :  { %3369 = vmatpush3.bf16.msra.mxu1 %v3366_v28  ;;  %3242 = vmatprep.mubr.msk.f32.mxu1 %vm54_vm0, %v3810_v45 }
 0x47c   :  { %3371 = vmatprep.subr.bf16.mxu1 %v3370_v18 }
 0x47f   :  { %3373 = vmatpush3.bf16.msra.mxu1 %v3370_v18 }
 0x480   :  { %3250 = vmatprep.subr.mxu1 %v3475_v16 }
 0x482   :  { %3243 = vmatmul.mubr.msk.f32.vlgmr.msra.gmra.mrb[26].mxu1 %vm54_vm0, %v3833_v53 }
 0x483   :  { %3252 = vmatprep.mubr.msk.f32.mxu1 %vm3476_vm1, %v3475_v16 }
 0x4af   :  { %v1463_v32 = vpop.xlane.xlu0 %1462 }
 0x4b0   :  { %3415 = vrcp.f32 %v1463_v32  ;;  %v1451_v33 = vpop.xlane.xlu1 %1450 }
 0x4b1   :  { %3417 = vrcp.f32 %v1451_v33 }
 0x4ba   :  { %v3416_v34 = vpop.eup %3415 }
 0x4bb   :  { %v3418_v35 = vpop.eup %3417  ;;  %v1481_v36 = vmul.f32 %v3416_v34, %v3412_v13  ;;  %v2927_v13 = vld [vmem:[%s3991_s4 + $0x178] sm:$0xff] }
 0x4bc   :  { %v1477_v37 = vmul.f32 %v3418_v35, %v3414_v3  ;;  %v3378_v15 = vpack.c.bf16 %v2927_v13, %v2926_v11 }
 0x4bd   :  { %1489 = vst.msk [vmem:[#allocation4 + $0x30] sm:$0xff] %vm230_vm2, %v1481_v36 }
 0x4be   :  { %1485 = vst.msk [vmem:[#allocation4 + $0x10] sm:$0xff] %vm230_vm2, %v1477_v37 }
 0x4f2   :  { %v1418_v40 = vpop.xlane.xlu1 %1417 }
 0x4f3   :  { %v1426_v41 = vsub.f32 %v3849_v10, %v1418_v40  ;;  %v1406_v42 = vpop.xlane.xlu0 %1405 }
 0x4f4   :  { %v1422_v43 = vsub.f32 %v1393_v17, %v1406_v42 }
 0x4f5   :  { %v1441_v44 = vmul.f32 1.442695, %v1426_v41 }
 0x4f6   :  { %v1433_v46 = vmul.f32 1.442695, %v1422_v43 }
 0x4f7   :  { %3419 = vpow2.f32 %v1441_v44 }
 0x4f8   :  { %3421 = vpow2.f32 %v1433_v46 }
 0x501   :  { %v3420_v47 = vpop.eup %3419 }
 0x502   :  { %v3422_v49 = vpop.eup %3421  ;;  %v1464_v50 = vsel %vm230_vm2, %v3420_v47, 0.0 }
 0x503   :  { %1465 = vadd.xlane.f32.xlu1 %v1464_v50  ;;  %v1452_v52 = vsel %vm230_vm2, %v3422_v49, 0.0 }
 0x504   :  { %1453 = vadd.xlane.f32.xlu0 %v1452_v52 }
 0x541   :  { %v1654_v54 = vpop.f32.mrb[18].mxu1 }
 0x542   :  { %v3197_v55 = vpop.f32.mrb[19].mxu1 }
 0x545   :  { %v1727_v56 = vpop.f32.mrb[20].mxu1 }
 0x546   :  { %v3202_v57 = vpop.f32.mrb[21].mxu1 }
 0x549   :  { %v1889_v58 = vpop.f32.mrb[22].mxu1 }
 0x54a   :  { %v3218_v59 = vpop.f32.mrb[23].mxu1  ;;  %3226 = vmatprep.mubr.msk.f32.mxu0 %vm230_vm2, %v1889_v58 }
 0x54d   :  { %v1962_v60 = vpop.f32.mrb[24].mxu1 }
 0x54e   :  { %v3223_v61 = vpop.f32.mrb[25].mxu1  ;;  %3227 = vmatmul.mubr.msk.f32.vlgmr.msra.gmra.mrb[18].mxu0 %vm230_vm2, %v1962_v60 }
 0x54f   :  { %3231 = vmatprep.mubr.msk.f32.mxu0 %vm230_vm2, %v1654_v54  ;;  %3230 = vmatpush3.msra.mxu0 %v1731_v39 }
 0x550   :  { %3245 = vmatprep.subr.mxu0 %v3475_v16 }
 0x555   :  { %v3244_v1 = vpop.f32.mrb[26].mxu1 }
 0x556   :  { %v2215_v3 = vadd.f32 %v3244_v1, %v2916_v62  ;;  %v2209_v14 = vpop.f32.mrb[27].mxu1  ;;  %3232 = vmatmul.mubr.msk.f32.vlgmr.msra.gmra.mrb[18].mxu0 %vm230_vm2, %v1727_v56 }
 0x557   :  { %v2210_v5 = vadd.f32 %v2916_v62, %v2209_v14  ;;  %3247 = vmatprep.mubr.msk.f32.mxu0 %vm3476_vm1, %v3475_v16 }
 0x558   :  { %3251 = vmatpush3.msra.mxu1 %v2215_v3 }
 0x559   :  { %3246 = vmatpush3.msra.mxu0 %v2210_v5  ;;  %3253 = vmatmul.mubr.msk.f32.vlgmr.msra.gmra.mrb[28].mxu1 %vm230_vm2, %v1481_v36 }
 0x55a   :  { %3375 = vmatprep.subr.bf16.mxu1 %v3374_v4  ;;  %3248 = vmatmul.mubr.msk.f32.vlgmr.msra.gmra.mrb[20].mxu0 %vm230_vm2, %v1477_v37 }
 0x55b   :  { %3377 = vmatpush3.bf16.msra.mxu1 %v3374_v4  ;;  %3268 = vmatprep.mubr.msk.f32.mxu1 %vm54_vm0, %v3810_v45  ;;  %v2921_v45 = vld [vmem:[%s3993_s6 + $0x10] sm:$0xff] }
 0x55c   :  { %3379 = vmatprep.subr.bf16.mxu1 %v3378_v15  ;;  %3255 = vmatprep.subr.mxu0 %v2921_v45 }
 0x55d   :  { %3256 = vmatpush3.msra.mxu0 %v2921_v45 }
 0x55e   :  { %3271 = vmatprep.subr.mxu0 %v3475_v16 }
 0x55f   :  { %3381 = vmatpush3.bf16.msra.mxu1 %v3378_v15 }
 0x562   :  { %3269 = vmatmul.mubr.msk.f32.vlgmr.msra.gmra.mrb[30].mxu1 %vm54_vm0, %v3833_v53 }
 0x590   :  { %v1466_v6 = vpop.xlane.xlu1 %1465 }
 0x591   :  { %3423 = vrcp.f32 %v1466_v6  ;;  %v1454_v7 = vpop.xlane.xlu0 %1453 }
 0x592   :  { %3425 = vrcp.f32 %v1454_v7 }
 0x59b   :  { %v3424_v8 = vpop.eup %3423 }
 0x59c   :  { %v3426_v9 = vpop.eup %3425  ;;  %v1482_v10 = vmul.f32 %v3424_v8, %v3420_v47 }
 0x59d   :  { %v1478_v12 = vmul.f32 %v3426_v9, %v3422_v49 }
 0x59e   :  { %1490 = vst.msk [vmem:[#allocation4 + $0x38] sm:$0xff] %vm230_vm2, %v1482_v10 }
 0x59f   :  { %1486 = vst.msk [vmem:[#allocation4 + $0x18] sm:$0xff] %vm230_vm2, %v1478_v12 }
 0x62c   :  { %v2360_v53 = vpop.f32.mrb[28].mxu1 }
 0x62d   :  { %v3254_v17 = vpop.f32.mrb[29].mxu1  ;;  %v2287_v19 = vpop.f32.mrb[20].mxu0 }
 0x62e   :  { %v3249_v20 = vpop.f32.mrb[21].mxu0  ;;  %3257 = vmatprep.mubr.msk.f32.mxu0 %vm230_vm2, %v2287_v19 }
 0x62f   :  { %3258 = vmatmul.mubr.msk.f32.vlgmr.msra.gmra.mrb[18].mxu0 %vm230_vm2, %v2360_v53 }
 0x630   :  { %3273 = vmatprep.mubr.msk.f32.mxu0 %vm3476_vm1, %v3475_v16 }
 0x635   :  { %v3270_v22 = vpop.f32.mrb[30].mxu1 }
 0x636   :  { %v2528_v23 = vpop.f32.mrb[31].mxu1  ;;  %v2534_v48 = vadd.f32 %v3270_v22, %v2929_v21 }
 0x637   :  { %v2529_v51 = vadd.f32 %v2929_v21, %v2528_v23 }
 0x639   :  { %3272 = vmatpush3.msra.mxu0 %v2529_v51 }
 0x63a   :  { %3274 = vmatmul.mubr.msk.f32.vlgmr.msra.gmra.mrb[22].mxu0 %vm230_vm2, %v1478_v12  ;;  %3276 = vmatprep.subr.mxu0 %v3475_v16 }
 0x63b   :  { %3277 = vmatpush3.msra.mxu0 %v2534_v48  ;;  %3278 = vmatprep.mubr.msk.f32.mxu0 %vm3476_vm1, %v3475_v16 }
 0x63c   :  { %3281 = vmatprep.subr.mxu0 %v2934_v24 }
 0x63e   :  { %3279 = vmatmul.mubr.msk.f32.vlgmr.msra.gmra.mrb[24].mxu0 %vm230_vm2, %v1482_v10 }
 0x63f   :  { %3282 = vmatpush3.msra.mxu0 %v2934_v24 }
 0x70d   :  { %v2606_v25 = vpop.f32.mrb[22].mxu0 }
 0x70e   :  { %v3275_v2 = vpop.f32.mrb[23].mxu0  ;;  %3283 = vmatprep.mubr.msk.f32.mxu0 %vm230_vm2, %v2606_v25 }
 0x711   :  { %v2679_v26 = vpop.f32.mrb[24].mxu0 }
 0x712   :  { %v3280_v27 = vpop.f32.mrb[25].mxu0  ;;  %3284 = vmatmul.mubr.msk.f32.vlgmr.msra.gmra.mrb[18].mxu0 %vm230_vm2, %v2679_v26 }
 0x713   :  { %3438 = shalt.err (!%p3435_p4)
}
 0x714   :  { %s3439_s3 = scalar_lea.hbm %s3996_s9, 1024 }
 0x715   :  { %p3440_p5 = scmp.ne.s32.totalorder %s3996_s9, %s3439_s3  ;;  %p3443_p6 = scmp.lt.u32.totalorder %s3439_s3, %s3996_s9 }
 0x717   :  { %p3445_p7 = pnand %p3443_p6, %p3440_p5 }
 0x719   :  { %3448 = shalt.err (!%p3445_p7)
}
 0x71a   :  { %s3479_s15 = smov 128   ;;  %s3480_s16 = smov 8   ;;  %v2937_v16 = vld [vmem:[%s3994_s7] ss:$0 sm:$0xff] }
 0x71b   :  { %2802 = dma.vmem_to_hbm [thread:$0]  %s2797_s10, 1024, %s3996_s9, [#allocation5], %s3479_s15, %s3479_s15, %s3480_s16  }
 0x71c   :  { %s3481_s21 = smov [#allocation2]  }
 0x71d   :  { %s2784_s22 = sshll.u32 %s3481_s21, 4  ;;  %s2785_s22 = int_to_ptr.vmem [resolvable:$true] %s2784_s22 }
 0x71e   :  { %s3449_s23 = scalar_lea.vmem %s2785_s22, 256  ;;  %p3454_p9 = scmp.lt.s32.totalorder %s2785_s22, %s2785_s22 }
 0x71f   :  { %p3450_p8 = scmp.ne.s32.totalorder %s2785_s22, %s3449_s23  ;;  %p3455_p10 = scmp.lt.s32.totalorder %s3449_s23, %s3449_s23 }
 0x721   :  { %p3456_p11 = por %p3455_p10, %p3454_p9 }
 0x723   :  { %p3457_p12 = pnand %p3456_p11, %p3450_p8 }
 0x7e5   :  { %v3285_v28 = vpop.f32.mrb[18].mxu0 }
 0x7e6   :  { %v2776_v29 = vadd.f32 %v3285_v28, %v2937_v16  ;;  %v2757_v30 = vpop.f32.mrb[19].mxu0 }
 0x7e7   :  { %v2775_v31 = vadd.f32 %v2937_v16, %v2757_v30 }
 0x7e8   :  { %2778 = vst.msk [vmem:[#allocation2 + $0x8] sm:$0xff] %vm54_vm0, %v2776_v29 }
 0x7e9   :  { %2777 = vst.msk [vmem:[#allocation2] sm:$0xff] %vm54_vm0, %v2775_v31 }
 0x7ea   :  { %3460 = shalt.err (!%p3457_p12)
}
 0x7eb   :  { %s3461_s24 = scalar_lea.hbm %s3995_s8, 256 }
 0x7ec   :  { %p3462_p13 = scmp.ne.s32.totalorder %s3995_s8, %s3461_s24  ;;  %p3465_p0 = scmp.lt.u32.totalorder %s3461_s24, %s3995_s8 }
 0x7ee   :  { %p3467_p1 = pnand %p3465_p0, %p3462_p13 }
 0x7f0   :  { %3470 = shalt.err (!%p3467_p1)
}
 0x7f1   :  { %2790 = dma.vmem_to_hbm [thread:$0]  %s2785_s22, 256, %s3995_s8, [#allocation3], %s3479_s15, %s3479_s15, %s3480_s16  }
 0x7f2   :  { %3471 = dma.done.wait [#allocation3], 256  }
 0x7f3   :  { %3472 = vsyncadd [#allocation3], 4294967040 }
 0x7f4   :  { %3473 = dma.done.wait [#allocation5], 1024  }
 0x7f5   :  { %3474 = vsyncadd [#allocation5], 4294966272 }
 0x7f6   :  { %2809 = vsyncpa [#allocation3], 1 }
 0x7f7   :  { %2810 = vsyncpa [#allocation5], 1 }

</bundles_post_ra>
